<compile_context>
chip_gen: v7x
topology: tpu7x:2x2x1
jax: 0.10.0
libtpu: 0.0.40
codegen_flags: <defaults>
</compile_context>

<pallas_src>
import functools

import jax
import jax.numpy as jnp
from jax import lax
from jax.experimental import pallas as pl
from jax.experimental.pallas import tpu as pltpu


def _round_down(v: int, m: int) -> int:
    return (v // m) * m


def _round_up(v: int, m: int) -> int:
    return ((v + m - 1) // m) * m


def _sublane_tile(dtype) -> int:
    # dtype-native sublane packing: 8 rows for 4-byte, 16 for 2-byte, 32 for 1-byte.
    return {4: 8, 2: 16, 1: 32}.get(jnp.dtype(dtype).itemsize, 8)


def _pick_tile_bytes() -> int:
    # ~1/8 of physical VMEM per input buffer: 16 MiB on 128 MiB parts (v5e/v6e),
    # 8 MiB on 64 MiB parts (v7x). Conservative fallback if the query is unavailable.
    try:
        info = pltpu.get_tpu_info()
        vmem = getattr(info, "vmem_capacity_bytes", None)
        if vmem:
            return max(4 * 1024 * 1024, min(16 * 1024 * 1024, int(vmem) // 8))
    except Exception:
        pass
    return 8 * 1024 * 1024


def _concat_pool_kernel(x_ref, out_ref, max_acc, sum_acc, *, hw, tk, needs_mask):
    k = pl.program_id(1)

    @pl.when(k == 0)
    def _init():
        max_acc[...] = jnp.full_like(max_acc, -jnp.inf)
        sum_acc[...] = jnp.zeros_like(sum_acc)

    x = x_ref[...]

    def _accumulate(x_for_max, x_for_sum):
        # Lane-axis reductions; only the (TM, 1) results are widened to f32.
        tile_max = jnp.max(x_for_max, axis=-1, keepdims=True).astype(jnp.float32)
        tile_sum = jnp.sum(x_for_sum, axis=-1, keepdims=True, dtype=jnp.float32)
        max_acc[...] = jnp.maximum(max_acc[...], tile_max)
        sum_acc[...] = sum_acc[...] + tile_sum

    if needs_mask:
        last = pl.num_programs(1) - 1

        @pl.when(k < last)
        def _full_tile():
            _accumulate(x, x)

        @pl.when(k == last)
        def _tail_tile():
            # (1, TK) iota broadcast over rows: no full-tile int/bool temporaries.
            lane = lax.broadcasted_iota(jnp.int32, (1, x.shape[-1]), 1)
            valid = (k * tk + lane) < hw
            if jnp.issubdtype(x.dtype, jnp.floating):
                # finfo.min (finite) is fp8-safe: e4m3 has no inf.
                fill = jnp.asarray(jnp.finfo(x.dtype).min, dtype=x.dtype)
            else:
                fill = jnp.asarray(jnp.iinfo(x.dtype).min, dtype=x.dtype)
            _accumulate(
                jnp.where(valid, x, fill),
                jnp.where(valid, x, jnp.zeros((), dtype=x.dtype)),
            )
    else:
        _accumulate(x, x)

    @pl.when(k == pl.num_programs(1) - 1)
    def _finalize():
        out_ref[:, 0:1] = max_acc[...].astype(out_ref.dtype)
        out_ref[:, 1:2] = (sum_acc[...] * (1.0 / hw)).astype(out_ref.dtype)


def adaptive_concat_pool2d(x: jax.Array) -> jax.Array:
    """x: (N, C, H, W) -> (N, 2*C, 1, 1); max-pool channels first, avg second."""
    N, C, H, W = x.shape
    R, HW = N * C, H * W
    dtype = x.dtype
    itemsize = jnp.dtype(dtype).itemsize
    sub = _sublane_tile(dtype)

    TILE_BYTES = _pick_tile_bytes()

    # Padded footprint accounting: lanes round to 128, sublanes to dtype tile.
    hw_pad = _round_up(HW, 128)
    min_rows = R if R < sub else sub
    rows_pad_min = _round_up(min_rows, sub)

    if rows_pad_min * hw_pad * itemsize <= TILE_BYTES:
        TK = HW                                     # full reduction width in one block
        needs_mask = False
    else:
        budget_lanes = max(128, _round_down(TILE_BYTES // (rows_pad_min * itemsize), 128))
        # Prefer a multiple of 128 that divides HW exactly, so the tail mask never runs.
        TK = 0
        t = budget_lanes
        while t >= 128:
            if HW % t == 0:
                TK = t
                break
            t -= 128
        if TK == 0:
            TK = max(128, min(budget_lanes, _round_down(HW, 128)))
        needs_mask = (HW % TK) != 0

    if TK == HW:
        if R <= sub:
            TM = R
        else:
            tk_pad_b = _round_up(TK, 128)
            tm_budget = max(sub, _round_down(TILE_BYTES // (tk_pad_b * itemsize), sub))
            TM = min(tm_budget, _round_down(R, sub))
            # Keep >=2 (prefer 4) row blocks so the "parallel" row axis can shard
            # across v7x's two TensorCores (harmless on 1-TC parts).
            if R >= 4 * sub:
                TM = min(TM, max(sub, _round_down(-(-R // 4), sub)))
            elif R >= 2 * sub:
                TM = min(TM, max(sub, _round_down(-(-R // 2), sub)))
    else:
        TM = min_rows

    grid = (pl.cdiv(R, TM), pl.cdiv(HW, TK))
    x2 = x.reshape(R, HW)

    # Explicit VMEM limit based on the padded, double-buffered footprint
    # (keeps v5e's 16 MiB scoped default from biting, stays under v7x's 64 MiB).
    tm_pad = _round_up(TM, sub)
    tk_pad = _round_up(TK, 128)
    in_block_bytes = tm_pad * tk_pad * itemsize
    out_block_bytes = tm_pad * 128 * itemsize        # (TM, 2) pads lanes to 128
    scratch_bytes = 2 * tm_pad * 128 * 4             # two f32 (TM, 1) accumulators
    needed = 2 * in_block_bytes + 2 * out_block_bytes + scratch_bytes
    vmem_limit = int(min(48 * 1024 * 1024, max(32 * 1024 * 1024, needed + (4 << 20))))

    kernel = functools.partial(
        _concat_pool_kernel, hw=HW, tk=TK, needs_mask=needs_mask
    )

    out2 = pl.pallas_call(
        kernel,
        out_shape=jax.ShapeDtypeStruct((R, 2), dtype),
        grid=grid,
        in_specs=[pl.BlockSpec((TM, TK), lambda i, k: (i, k))],
        out_specs=pl.BlockSpec((TM, 2), lambda i, k: (i, 0)),
        scratch_shapes=[
            pltpu.VMEM((TM, 1), jnp.float32),   # running max
            pltpu.VMEM((TM, 1), jnp.float32),   # running sum
        ],
        compiler_params=pltpu.CompilerParams(
            dimension_semantics=("parallel", "arbitrary"),
            vmem_limit_bytes=vmem_limit,
        ),
        cost_estimate=pl.CostEstimate(
            flops=2 * R * HW,
            transcendentals=0,
            bytes_accessed=R * HW * itemsize + R * 2 * itemsize,
        ),
    )(x2)

    # (R, 2) -> (N, C, 2) -> (N, 2, C) -> (N, 2*C, 1, 1): all max channels first, then avg.
    out = jnp.moveaxis(out2.reshape(N, C, 2), -1, 1).reshape(N, 2 * C, 1, 1)
    return out


if __name__ == "__main__":
    key = jax.random.PRNGKey(0)
    x = jax.random.normal(key, (2, 4, 16, 16), dtype=jnp.float32)

    out = adaptive_concat_pool2d(x)
    out = jax.block_until_ready(out)

    # Reference check against plain JAX.
    ref_max = jnp.max(x, axis=(2, 3), keepdims=True)
    ref_avg = jnp.mean(x, axis=(2, 3), keepdims=True)
    ref = jnp.concatenate([ref_max, ref_avg], axis=1)

    assert out.shape == (2, 8, 1, 1), out.shape
    assert out.dtype == x.dtype
    assert jnp.allclose(out, ref, atol=1e-5, rtol=1e-5)

    print("KERNEL_OK")
</pallas_src>

<mosaic_0001>
module attributes {stable_mosaic.version = 11 : i64} {
  func.func @_concat_pool_kernel(%arg0: i32, %arg1: i32, %arg2: memref<8x256xf32, #tpu.memory_space<vmem>>, %arg3: memref<8x2xf32, #tpu.memory_space<vmem>>, %arg4: memref<8x1xf32, #tpu.memory_space<vmem>>, %arg5: memref<8x1xf32, #tpu.memory_space<vmem>>) attributes {dimension_semantics = [#tpu.dimension_semantics<parallel>, #tpu.dimension_semantics<arbitrary>], iteration_bounds = array<i64: 1, 1>, scalar_prefetch = 0 : i64, scratch_operands = 2 : i64, tpu.core_type = #tpu.core_type<tc>, window_params = [{transform_indices = @transform_0, window_bounds = array<i64: 8, 256>}, {transform_indices = @transform_1, window_bounds = array<i64: 8, 2>}]} {
    %c0_i32 = arith.constant 0 : i32
    %0 = arith.cmpi eq, %arg1, %c0_i32 : i32
    %1 = arith.extui %0 : i1 to i32
    %c0_i32_0 = arith.constant 0 : i32
    %2 = arith.cmpi ne, %1, %c0_i32_0 : i32
    scf.if %2 {
      %cst_13 = arith.constant 0xFF800000 : f32
      %17 = vector.broadcast %cst_13 : f32 to vector<8x1xf32>
      %c0_14 = arith.constant 0 : index
      %c0_15 = arith.constant 0 : index
      %18 = vector.load %arg4[%c0_14, %c0_15] : memref<8x1xf32, #tpu.memory_space<vmem>>, vector<8x1xf32>
      tpu.vector_store %arg4[%c0_14, %c0_15], %17 {strides = array<i32>} : memref<8x1xf32, #tpu.memory_space<vmem>>, vector<8x1xf32>,
      %cst_16 = arith.constant 0.000000e+00 : f32
      %19 = vector.broadcast %cst_16 : f32 to vector<8x1xf32>
      %c0_17 = arith.constant 0 : index
      %c0_18 = arith.constant 0 : index
      %20 = vector.load %arg5[%c0_17, %c0_18] : memref<8x1xf32, #tpu.memory_space<vmem>>, vector<8x1xf32>
      tpu.vector_store %arg5[%c0_17, %c0_18], %19 {strides = array<i32>} : memref<8x1xf32, #tpu.memory_space<vmem>>, vector<8x1xf32>,
    } else {
    }
    %c0 = arith.constant 0 : index
    %c0_1 = arith.constant 0 : index
    %3 = vector.load %arg2[%c0, %c0_1] : memref<8x256xf32, #tpu.memory_space<vmem>>, vector<8x256xf32>
    %cst = arith.constant dense<0xFF800000> : vector<8xf32>
    %4 = vector.multi_reduction <maximumf>, %3, %cst [1] : vector<8x256xf32> to vector<8xf32>
    %5 = vector.shape_cast %4 : vector<8xf32> to vector<8x1xf32>
    %cst_2 = arith.constant dense<0.000000e+00> : vector<8xf32>
    %6 = vector.multi_reduction <add>, %3, %cst_2 [1] : vector<8x256xf32> to vector<8xf32>
    %7 = vector.shape_cast %6 : vector<8xf32> to vector<8x1xf32>
    %c0_3 = arith.constant 0 : index
    %c0_4 = arith.constant 0 : index
    %8 = vector.load %arg4[%c0_3, %c0_4] : memref<8x1xf32, #tpu.memory_space<vmem>>, vector<8x1xf32>
    %9 = arith.maximumf %8, %5 : vector<8x1xf32>
    %c0_5 = arith.constant 0 : index
    %c0_6 = arith.constant 0 : index
    %10 = vector.load %arg4[%c0_5, %c0_6] : memref<8x1xf32, #tpu.memory_space<vmem>>, vector<8x1xf32>
    tpu.vector_store %arg4[%c0_5, %c0_6], %9 {strides = array<i32>} : memref<8x1xf32, #tpu.memory_space<vmem>>, vector<8x1xf32>,
    %c0_7 = arith.constant 0 : index
    %c0_8 = arith.constant 0 : index
    %11 = vector.load %arg5[%c0_7, %c0_8] : memref<8x1xf32, #tpu.memory_space<vmem>>, vector<8x1xf32>
    %12 = arith.addf %11, %7 : vector<8x1xf32>
    %c0_9 = arith.constant 0 : index
    %c0_10 = arith.constant 0 : index
    %13 = vector.load %arg5[%c0_9, %c0_10] : memref<8x1xf32, #tpu.memory_space<vmem>>, vector<8x1xf32>
    tpu.vector_store %arg5[%c0_9, %c0_10], %12 {strides = array<i32>} : memref<8x1xf32, #tpu.memory_space<vmem>>, vector<8x1xf32>,
    %c0_i32_11 = arith.constant 0 : i32
    %14 = arith.cmpi eq, %arg1, %c0_i32_11 : i32
    %15 = arith.extui %14 : i1 to i32
    %c0_i32_12 = arith.constant 0 : i32
    %16 = arith.cmpi ne, %15, %c0_i32_12 : i32
    scf.if %16 {
      %c0_13 = arith.constant 0 : index
      %c0_14 = arith.constant 0 : index
      %17 = vector.load %arg4[%c0_13, %c0_14] : memref<8x1xf32, #tpu.memory_space<vmem>>, vector<8x1xf32>
      %c0_15 = arith.constant 0 : index
      %c0_16 = arith.constant 0 : index
      %18 = vector.load %arg3[%c0_15, %c0_16] : memref<8x2xf32, #tpu.memory_space<vmem>>, vector<8x1xf32>
      tpu.vector_store %arg3[%c0_15, %c0_16], %17 {strides = array<i32>} : memref<8x2xf32, #tpu.memory_space<vmem>>, vector<8x1xf32>,
      %c0_17 = arith.constant 0 : index
      %c0_18 = arith.constant 0 : index
      %19 = vector.load %arg5[%c0_17, %c0_18] : memref<8x1xf32, #tpu.memory_space<vmem>>, vector<8x1xf32>
      %cst_19 = arith.constant 3.906250e-03 : f32
      %20 = vector.broadcast %cst_19 : f32 to vector<8x1xf32>
      %21 = arith.mulf %19, %20 : vector<8x1xf32>
      %c0_20 = arith.constant 0 : index
      %c1 = arith.constant 1 : index
      %22 = vector.load %arg3[%c0_20, %c1] : memref<8x2xf32, #tpu.memory_space<vmem>>, vector<8x1xf32>
      tpu.vector_store %arg3[%c0_20, %c1], %21 {strides = array<i32>} : memref<8x2xf32, #tpu.memory_space<vmem>>, vector<8x1xf32>,
    } else {
    }
    return
  }
  func.func @transform_0(%arg0: i32, %arg1: i32) -> (i32, i32) {
    %c0_i32 = arith.constant 0 : i32
    return %arg0, %arg1 : i32, i32
  }
  func.func @transform_1(%arg0: i32, %arg1: i32) -> (i32, i32) {
    %c0_i32 = arith.constant 0 : i32
    %c0_i32_0 = arith.constant 0 : i32
    return %arg0, %c0_i32 : i32, i32
  }
}

</mosaic_0001>

<bundles_post_ra>
// kernel: tpu_custom_call.1
= control target key start
LH: loop header
LB: loop body
LE: loop exit
PB: predicated region body
PF: predicated region fallthrough
CT: control target
= control target key end

     0   :  { %6 = vsyncpa [#allocation5], 0  ;;  %s88_s6 = smov [#allocation4]   ;;  %s125_s0 = inlined_call_operand.hbm [shape: f32[8,256], index: 0, kind: input, shape index: {}]   ;;  %s126_s1 = inlined_call_operand.vmem [shape: f32[8,2], index: 1, kind: output, shape index: {}]  }
   0x1   :  { %s13_s7 = sshll.u32 %s88_s6, 4  ;;  %s64_s10 = scalar_lea.hbm %s125_s0, 256  ;;  %s14_s7 = int_to_ptr.vmem [resolvable:$true] %s13_s7 }
   0x2   :  { %p65_p0 = scmp.ne.s32.totalorder %s125_s0, %s64_s10  ;;  %p68_p1 = scmp.lt.u32.totalorder %s64_s10, %s125_s0 }
   0x4   :  { %p70_p2 = pnand %p68_p1, %p65_p0 }
   0x6   :  { %73 = shalt.err (!%p70_p2)
}
   0x7   :  { %s74_s15 = scalar_lea.vmem %s14_s7, 256  ;;  %p79_p4 = scmp.lt.s32.totalorder %s14_s7, %s14_s7 }
   0x8   :  { %p75_p3 = scmp.ne.s32.totalorder %s14_s7, %s74_s15  ;;  %p80_p5 = scmp.lt.s32.totalorder %s74_s15, %s74_s15 }
   0xa   :  { %p81_p6 = por %p80_p5, %p79_p4 }
   0xc   :  { %p82_p7 = pnand %p81_p6, %p75_p3 }
   0xe   :  { %85 = shalt.err (!%p82_p7)
}
   0xf   :  { %16 = dma.hbm_to_vmem [thread:$0]  %s125_s0, 256, %s14_s7, [#allocation5]  }
  0x10   :  { %86 = dma.done.wait [#allocation5], 256  }
  0x11   :  { %87 = vsyncadd [#allocation5], 4294967040  ;;  %vm24_vm0 = vcmask 7168   ;;  %v89_v0 = vmov 0.0   ;;  %v27_v1 = vld [vmem:[#allocation4] sm:$0xff]  ;;  %v28_v2 = vld [vmem:[#allocation4 + $0x8] sm:$0xff] }
  0x12   :  { %26 = vst.msk [vmem:[#allocation3] sm:$0xff] %vm24_vm0, %v89_v0  ;;  %v32_v3 = vadd.f32 %v28_v2, %v27_v1  ;;  %v29_v4 = vmax.f32 %v27_v1, %v28_v2  ;;  %v90_v5 = vmov -inf   ;;  %s91_s0 = smov 1   ;;  %vm53_vm1 = vcmask 15368  }
  0x13   :  { %25 = vst.msk [vmem:[#allocation2] sm:$0xff] %vm24_vm0, %v90_v5 }
  0x14   :  { %33 = vadd.xlane.f32.xlu0 %v32_v3 }
  0x18   :  { %30 = vmax.xlane.f32.xlu0 %v29_v4 }
  0x19   :  { %v39_v6 = vld [vmem:[#allocation3] sm:$0xff] }
  0x1a   :  { %v35_v9 = vld [vmem:[#allocation2] sm:$0xff] }
  0xa1   :  { %v34_v7 = vpop.xlane.xlu0 %33 }
  0xa2   :  { %v40_v8 = vadd.f32 %v39_v6, %v34_v7 }
  0xa4   :  { %41 = vst.msk [vmem:[#allocation3] sm:$0xff] %vm24_vm0, %v40_v8 }
  0xa5   :  { %v31_v10 = vpop.xlane.xlu0 %30 }
  0xa6   :  { %v36_v11 = vmax.f32 %v35_v9, %v31_v10 }
  0xa8   :  { %38 = vst.msk [vmem:[#allocation2] sm:$0xff] %vm24_vm0, %v36_v11 }
  0xab   :  { %v47_v12 = vld [vmem:[#allocation3] sm:$0xff] }
  0xac   :  { %v48_v13 = vmul.f32 0.00390625, %v47_v12 }
  0xae   :  { %50 = vrot.lane.b32.xlu1 %v48_v13, %s91_s0 }
  0xaf   :  { %v45_v14 = vld [vmem:[#allocation2] sm:$0xff] }
  0xb0   :  { %46 = vst.msk [vmem:[%s126_s1] sm:$0xff] %vm24_vm0, %v45_v14 }
 0x120   :  { %v51_v15 = vpop.permute.xlu1 %50 }
 0x121   :  { %54 = vst.msk [vmem:[%s126_s1] sm:$0xff] %vm53_vm1, %v51_v15 }
 0x122   :  { %59 = vsyncpa [#allocation5], 1 }

</bundles_post_ra>
